<compile_context>
chip_gen: v7x
topology: tpu7x:2x2x1
jax: 0.10.0
libtpu: 0.0.40
codegen_flags: <defaults>
</compile_context>

<pallas_src>
import jax
import jax.numpy as jnp
from jax.experimental import pallas as pl
from jax.experimental.pallas import tpu as pltpu


def _round_up(x, m):
    return ((x + m - 1) // m) * m


def _mixer_kernel(x_ref, w1_ref, b1_ref, w2_ref, b2_ref, w3_ref, b3_ref, o_ref):
    """One row-tile of the fused (main-net + V-branch) 3-matmul MLP."""
    cdt = w1_ref.dtype                                    # compute dtype
    x = x_ref[...]                                        # (tm, in_dim)

    # Fused layer 1: [h1 | v1] = relu(x @ W1_big + b1_big), f32 accumulation.
    hv = jnp.dot(x, w1_ref[...], preferred_element_type=jnp.float32)
    hv = jnp.maximum(hv + b1_ref[...], 0.0)

    # Fused layer 2: [h2 | v1] = relu(hv @ [[w2,0],[0,I]] + [b2 | 0]).
    hv2 = jnp.dot(hv.astype(cdt), w2_ref[...], preferred_element_type=jnp.float32)
    hv2 = jnp.maximum(hv2 + b2_ref[...], 0.0)

    # Fused output: z + v = [h2 | v1] @ [[w3],[vw2]] + (b3 + vb2).
    z = jnp.dot(hv2.astype(cdt), w3_ref[...], preferred_element_type=jnp.float32)
    o_ref[...] = (z + b3_ref[...]).astype(o_ref.dtype)


def dres_central_mixer(agent_qs, states, params, *, target,
                       n_agents, n_quantiles, n_target_quantiles,
                       tm=4096, compute_dtype=jnp.bfloat16):
    """JAX/Pallas equivalent of DRESCentralMixer.forward (central_mixer='f')."""
    B, T = agent_qs.shape[0], agent_qs.shape[1]
    state_dim = states.shape[-1]
    n_rnd = n_target_quantiles if target else n_quantiles
    assert agent_qs.shape == (B, T, n_agents, n_rnd)
    assert states.shape == (B, T, state_dim)

    N = B * T
    q_dim = n_agents * n_rnd
    in_dim = state_dim + q_dim

    (w1, b1, w2, b2, w3, b3, vw1, vb1, vw2, vb2) = params
    embed_dim = w1.shape[1]
    out_dim = w3.shape[1]
    hid2 = 2 * embed_dim
    assert w1.shape[0] == in_dim, "target/quantile dims must match net input"
    assert out_dim == n_rnd

    f32 = jnp.float32
    w1 = jnp.asarray(w1, f32)
    vw1 = jnp.asarray(vw1, f32)
    w2 = jnp.asarray(w2, f32)
    w3 = jnp.asarray(w3, f32)
    vw2 = jnp.asarray(vw2, f32)

    # --- Wrapper-side weight fusion (tiny matrices, done once) -------------
    w1_big = jnp.concatenate(
        [jnp.concatenate([w1[:state_dim], vw1], axis=1),
         jnp.concatenate([w1[state_dim:], jnp.zeros((q_dim, embed_dim), f32)],
                         axis=1)], axis=0)                       # (in_dim, 2E)
    w2_big = jnp.concatenate(
        [jnp.concatenate([w2, jnp.zeros((embed_dim, embed_dim), f32)], axis=1),
         jnp.concatenate([jnp.zeros((embed_dim, embed_dim), f32),
                          jnp.eye(embed_dim, dtype=f32)], axis=1)],
        axis=0)                                                  # (2E, 2E)
    w3_big = jnp.concatenate([w3, vw2], axis=0)                  # (2E, out)

    b1_big = jnp.concatenate([jnp.asarray(b1, f32).reshape(1, -1),
                              jnp.asarray(vb1, f32).reshape(1, -1)], axis=1)
    b2_big = jnp.concatenate([jnp.asarray(b2, f32).reshape(1, -1),
                              jnp.zeros((1, embed_dim), f32)], axis=1)
    b3_big = (jnp.asarray(b3, f32) + jnp.asarray(vb2, f32)).reshape(1, -1)

    w1c = w1_big.astype(compute_dtype)
    w2c = w2_big.astype(compute_dtype)
    w3c = w3_big.astype(compute_dtype)

    # --- Single streamed activation: concat + cast fused in one pass -------
    s_f = states.reshape(N, state_dim)
    q_f = agent_qs.reshape(N, q_dim)
    x_c = jnp.concatenate([s_f, q_f], axis=1).astype(compute_dtype)  # (N, in_dim)

    # --- Row tiling: big tile, >=2 grid steps when possible, no padding ----
    tm_cap = max(16, _round_up(-(-N // 2), 16))     # keep 2 steps for v7x's 2 TCs
    tm_eff = max(16, min(_round_up(tm, 16), tm_cap))
    grid = (pl.cdiv(N, tm_eff),)                    # partial last block is masked

    rows = lambda i: (i, 0)   # row-streamed operands
    full = lambda i: (0, 0)   # grid-invariant resident operands

    itemsize = jnp.dtype(compute_dtype).itemsize
    mm_weights = in_dim * hid2 + hid2 * hid2 + hid2 * out_dim
    cost = pl.CostEstimate(
        flops=2 * N * mm_weights,
        transcendentals=0,
        bytes_accessed=(N * (in_dim * itemsize + out_dim * 4)
                        + mm_weights * itemsize + (2 * hid2 + out_dim) * 4))

    out = pl.pallas_call(
        _mixer_kernel,
        out_shape=jax.ShapeDtypeStruct((N, out_dim), jnp.float32),
        grid_spec=pltpu.PrefetchScalarGridSpec(
            num_scalar_prefetch=0,
            grid=grid,
            in_specs=[
                pl.BlockSpec((tm_eff, in_dim), rows),      # x = [states | qs]
                pl.BlockSpec((in_dim, hid2), full),        # W1_big
                pl.BlockSpec((1, hid2), full),             # b1_big (f32)
                pl.BlockSpec((hid2, hid2), full),          # W2_big
                pl.BlockSpec((1, hid2), full),             # b2_big (f32)
                pl.BlockSpec((hid2, out_dim), full),       # W3_big
                pl.BlockSpec((1, out_dim), full),          # b3 + vb2 (f32)
            ],
            out_specs=pl.BlockSpec((tm_eff, out_dim), rows),
        ),
        compiler_params=pltpu.CompilerParams(
            dimension_semantics=("parallel",)),
        cost_estimate=cost,
    )(x_c, w1c, b1_big, w2c, b2_big, w3c, b3_big)

    return out.reshape(B, T, 1, n_rnd)


def _reference(agent_qs, states, params, *, n_agents, n_rnd):
    B, T = agent_qs.shape[0], agent_qs.shape[1]
    state_dim = states.shape[-1]
    s = states.reshape(-1, state_dim)
    q = agent_qs.reshape(-1, n_agents * n_rnd)
    x = jnp.concatenate([s, q], axis=1)
    (w1, b1, w2, b2, w3, b3, vw1, vb1, vw2, vb2) = params
    h = jnp.maximum(x @ w1 + b1, 0.0)
    h = jnp.maximum(h @ w2 + b2, 0.0)
    z = h @ w3 + b3
    v = jnp.maximum(s @ vw1 + vb1, 0.0) @ vw2 + vb2
    return (z + v).reshape(B, T, 1, n_rnd)


if __name__ == "__main__":
    # Small, module-consistent shapes.
    B, T = 2, 8                      # batch, episode_length
    n_agents = 4
    n_quantiles = 8
    n_target_quantiles = 8
    state_dim = 16
    embed_dim = 32                   # central_mixing_embed_dim
    input_dim = n_agents * n_target_quantiles + state_dim

    key = jax.random.PRNGKey(0)
    keys = jax.random.split(key, 13)

    def w(k, shape):
        return jax.random.normal(k, shape, jnp.float32) * 0.1

    params = (
        w(keys[0], (input_dim, embed_dim)),  w(keys[1], (1, embed_dim)),
        w(keys[2], (embed_dim, embed_dim)),  w(keys[3], (1, embed_dim)),
        w(keys[4], (embed_dim, n_target_quantiles)), w(keys[5], (1, n_target_quantiles)),
        w(keys[6], (state_dim, embed_dim)),  w(keys[7], (1, embed_dim)),
        w(keys[8], (embed_dim, n_target_quantiles)), w(keys[9], (1, n_target_quantiles)),
    )

    agent_qs = jax.random.normal(keys[10], (B, T, n_agents, n_target_quantiles),
                                 jnp.float32)
    states = jax.random.normal(keys[11], (B, T, state_dim), jnp.float32)
    ref = _reference(agent_qs, states, params,
                     n_agents=n_agents, n_rnd=n_target_quantiles)

    # 1) bf16 activations/weights, f32 accumulation (the fast path).
    out_bf16 = dres_central_mixer(agent_qs, states, params, target=True,
                                  n_agents=n_agents, n_quantiles=n_quantiles,
                                  n_target_quantiles=n_target_quantiles,
                                  compute_dtype=jnp.bfloat16)
    out_bf16 = jax.block_until_ready(out_bf16)
    assert out_bf16.shape == (B, T, 1, n_target_quantiles)
    assert jnp.allclose(out_bf16, ref, atol=5e-2, rtol=5e-2)

    # 2) full f32 path (tight check against the reference).
    out_f32 = dres_central_mixer(agent_qs, states, params, target=True,
                                 n_agents=n_agents, n_quantiles=n_quantiles,
                                 n_target_quantiles=n_target_quantiles,
                                 compute_dtype=jnp.float32)
    out_f32 = jax.block_until_ready(out_f32)
    assert jnp.allclose(out_f32, ref, atol=1e-4, rtol=1e-4)

    # 3) row count not a multiple of the tile (exercises the masked partial
    #    final block — no input padding is done any more).
    B2, T2 = 3, 5
    aq2 = jax.random.normal(keys[12], (B2, T2, n_agents, n_target_quantiles),
                            jnp.float32)
    st2 = jax.random.normal(keys[11], (B2, T2, state_dim), jnp.float32)
    out2 = dres_central_mixer(aq2, st2, params, target=True,
                              n_agents=n_agents, n_quantiles=n_quantiles,
                              n_target_quantiles=n_target_quantiles,
                              compute_dtype=jnp.bfloat16)
    out2 = jax.block_until_ready(out2)
    ref2 = _reference(aq2, st2, params,
                      n_agents=n_agents, n_rnd=n_target_quantiles)
    assert out2.shape == (B2, T2, 1, n_target_quantiles)
    assert jnp.allclose(out2, ref2, atol=5e-2, rtol=5e-2)

    print("KERNEL_OK")
</pallas_src>

<mosaic_0001>
module attributes {stable_mosaic.version = 11 : i64} {
  func.func @_mixer_kernel(%arg0: i32, %arg1: memref<16x48xbf16, #tpu.memory_space<vmem>>, %arg2: memref<48x64xbf16, #tpu.memory_space<vmem>>, %arg3: memref<1x64xf32, #tpu.memory_space<vmem>>, %arg4: memref<64x64xbf16, #tpu.memory_space<vmem>>, %arg5: memref<1x64xf32, #tpu.memory_space<vmem>>, %arg6: memref<64x8xbf16, #tpu.memory_space<vmem>>, %arg7: memref<1x8xf32, #tpu.memory_space<vmem>>, %arg8: memref<16x8xf32, #tpu.memory_space<vmem>>) attributes {dimension_semantics = [#tpu.dimension_semantics<parallel>], iteration_bounds = array<i64: 1>, scalar_prefetch = 0 : i64, scratch_operands = 0 : i64, tpu.core_type = #tpu.core_type<tc>, window_params = [{transform_indices = @transform_0, window_bounds = array<i64: 16, 48>}, {pipeline_mode = #tpu.pipeline_mode<synchronous>, transform_indices = @transform_1, window_bounds = array<i64: 48, 64>}, {pipeline_mode = #tpu.pipeline_mode<synchronous>, transform_indices = @transform_2, window_bounds = array<i64: 1, 64>}, {pipeline_mode = #tpu.pipeline_mode<synchronous>, transform_indices = @transform_3, window_bounds = array<i64: 64, 64>}, {pipeline_mode = #tpu.pipeline_mode<synchronous>, transform_indices = @transform_4, window_bounds = array<i64: 1, 64>}, {pipeline_mode = #tpu.pipeline_mode<synchronous>, transform_indices = @transform_5, window_bounds = array<i64: 64, 8>}, {pipeline_mode = #tpu.pipeline_mode<synchronous>, transform_indices = @transform_6, window_bounds = array<i64: 1, 8>}, {transform_indices = @transform_7, window_bounds = array<i64: 16, 8>}]} {
    %c0 = arith.constant 0 : index
    %c0_0 = arith.constant 0 : index
    %0 = vector.load %arg1[%c0, %c0_0] : memref<16x48xbf16, #tpu.memory_space<vmem>>, vector<16x48xbf16>
    %c0_1 = arith.constant 0 : index
    %c0_2 = arith.constant 0 : index
    %1 = vector.load %arg2[%c0_1, %c0_2] : memref<48x64xbf16, #tpu.memory_space<vmem>>, vector<48x64xbf16>
    %cst = arith.constant dense<0.000000e+00> : vector<16x64xf32>
    %2 = tpu.matmul %0, %1, %cst {dimension_numbers = #tpu.dot_dimension_numbers<[1], [0], [0], [1], [0, 0, 1, 1], [], []>} : vector<16x48xbf16>, vector<48x64xbf16>, vector<16x64xf32> -> vector<16x64xf32>
    %c0_3 = arith.constant 0 : index
    %c0_4 = arith.constant 0 : index
    %3 = vector.load %arg3[%c0_3, %c0_4] : memref<1x64xf32, #tpu.memory_space<vmem>>, vector<1x64xf32>
    %4 = vector.broadcast %3 : vector<1x64xf32> to vector<16x64xf32>
    %5 = arith.addf %2, %4 : vector<16x64xf32>
    %cst_5 = arith.constant 0.000000e+00 : f32
    %6 = vector.broadcast %cst_5 : f32 to vector<16x64xf32>
    %7 = arith.maximumf %5, %6 : vector<16x64xf32>
    %8 = arith.truncf %7 : vector<16x64xf32> to vector<16x64xbf16>
    %c0_6 = arith.constant 0 : index
    %c0_7 = arith.constant 0 : index
    %9 = vector.load %arg4[%c0_6, %c0_7] : memref<64x64xbf16, #tpu.memory_space<vmem>>, vector<64x64xbf16>
    %cst_8 = arith.constant dense<0.000000e+00> : vector<16x64xf32>
    %10 = tpu.matmul %8, %9, %cst_8 {dimension_numbers = #tpu.dot_dimension_numbers<[1], [0], [0], [1], [0, 0, 1, 1], [], []>} : vector<16x64xbf16>, vector<64x64xbf16>, vector<16x64xf32> -> vector<16x64xf32>
    %c0_9 = arith.constant 0 : index
    %c0_10 = arith.constant 0 : index
    %11 = vector.load %arg5[%c0_9, %c0_10] : memref<1x64xf32, #tpu.memory_space<vmem>>, vector<1x64xf32>
    %12 = vector.broadcast %11 : vector<1x64xf32> to vector<16x64xf32>
    %13 = arith.addf %10, %12 : vector<16x64xf32>
    %cst_11 = arith.constant 0.000000e+00 : f32
    %14 = vector.broadcast %cst_11 : f32 to vector<16x64xf32>
    %15 = arith.maximumf %13, %14 : vector<16x64xf32>
    %16 = arith.truncf %15 : vector<16x64xf32> to vector<16x64xbf16>
    %c0_12 = arith.constant 0 : index
    %c0_13 = arith.constant 0 : index
    %17 = vector.load %arg6[%c0_12, %c0_13] : memref<64x8xbf16, #tpu.memory_space<vmem>>, vector<64x8xbf16>
    %cst_14 = arith.constant dense<0.000000e+00> : vector<16x8xf32>
    %18 = tpu.matmul %16, %17, %cst_14 {dimension_numbers = #tpu.dot_dimension_numbers<[1], [0], [0], [1], [0, 0, 1, 1], [], []>} : vector<16x64xbf16>, vector<64x8xbf16>, vector<16x8xf32> -> vector<16x8xf32>
    %c0_15 = arith.constant 0 : index
    %c0_16 = arith.constant 0 : index
    %19 = vector.load %arg7[%c0_15, %c0_16] : memref<1x8xf32, #tpu.memory_space<vmem>>, vector<1x8xf32>
    %20 = vector.broadcast %19 : vector<1x8xf32> to vector<16x8xf32>
    %21 = arith.addf %18, %20 : vector<16x8xf32>
    %c0_17 = arith.constant 0 : index
    %c0_18 = arith.constant 0 : index
    %22 = vector.load %arg8[%c0_17, %c0_18] : memref<16x8xf32, #tpu.memory_space<vmem>>, vector<16x8xf32>
    tpu.vector_store %arg8[%c0_17, %c0_18], %21 {strides = array<i32>} : memref<16x8xf32, #tpu.memory_space<vmem>>, vector<16x8xf32>,
    return
  }
  func.func @transform_0(%arg0: i32) -> (i32, i32) {
    %c0_i32 = arith.constant 0 : i32
    %c0_i32_0 = arith.constant 0 : i32
    return %arg0, %c0_i32 : i32, i32
  }
  func.func @transform_1(%arg0: i32) -> (i32, i32) {
    %c0_i32 = arith.constant 0 : i32
    %c0_i32_0 = arith.constant 0 : i32
    %c0_i32_1 = arith.constant 0 : i32
    return %c0_i32, %c0_i32_0 : i32, i32
  }
  func.func @transform_2(%arg0: i32) -> (i32, i32) {
    %c0_i32 = arith.constant 0 : i32
    %c0_i32_0 = arith.constant 0 : i32
    %c0_i32_1 = arith.constant 0 : i32
    return %c0_i32, %c0_i32_0 : i32, i32
  }
  func.func @transform_3(%arg0: i32) -> (i32, i32) {
    %c0_i32 = arith.constant 0 : i32
    %c0_i32_0 = arith.constant 0 : i32
    %c0_i32_1 = arith.constant 0 : i32
    return %c0_i32, %c0_i32_0 : i32, i32
  }
  func.func @transform_4(%arg0: i32) -> (i32, i32) {
    %c0_i32 = arith.constant 0 : i32
    %c0_i32_0 = arith.constant 0 : i32
    %c0_i32_1 = arith.constant 0 : i32
    return %c0_i32, %c0_i32_0 : i32, i32
  }
  func.func @transform_5(%arg0: i32) -> (i32, i32) {
    %c0_i32 = arith.constant 0 : i32
    %c0_i32_0 = arith.constant 0 : i32
    %c0_i32_1 = arith.constant 0 : i32
    return %c0_i32, %c0_i32_0 : i32, i32
  }
  func.func @transform_6(%arg0: i32) -> (i32, i32) {
    %c0_i32 = arith.constant 0 : i32
    %c0_i32_0 = arith.constant 0 : i32
    %c0_i32_1 = arith.constant 0 : i32
    return %c0_i32, %c0_i32_0 : i32, i32
  }
  func.func @transform_7(%arg0: i32) -> (i32, i32) {
    %c0_i32 = arith.constant 0 : i32
    %c0_i32_0 = arith.constant 0 : i32
    return %arg0, %c0_i32 : i32, i32
  }
}

</mosaic_0001>

<bundles_post_ra>
// kernel: tpu_custom_call.1
= control target key start
LH: loop header
LB: loop body
LE: loop exit
PB: predicated region body
PF: predicated region fallthrough
CT: control target
= control target key end

     0   :  { %12 = vsyncpa [#allocation3], 0  ;;  %s412_s24 = smov [#allocation2]   ;;  %s516_s0 = inlined_call_operand.vmem [shape: bf16[16,48], index: 0, kind: input, shape index: {}]   ;;  %s517_s1 = inlined_call_operand.hbm [shape: bf16[48,64], index: 1, kind: input, shape index: {}]   ;;  %s518_s2 = inlined_call_operand.vmem [shape: f32[1,64], index: 2, kind: input, shape index: {}]   ;;  %s519_s3 = inlined_call_operand.vmem [shape: bf16[64,64], index: 3, kind: input, shape index: {}]   ;;  %s520_s4 = inlined_call_operand.vmem [shape: f32[1,64], index: 4, kind: input, shape index: {}]   ;;  %s521_s5 = inlined_call_operand.vmem [shape: bf16[64,8], index: 5, kind: input, shape index: {}]   ;;  %s522_s6 = inlined_call_operand.vmem [shape: f32[1,8], index: 6, kind: input, shape index: {}]   ;;  %s523_s7 = inlined_call_operand.vmem [shape: f32[16,8], index: 7, kind: output, shape index: {}]  }
   0x1   :  { %s20_s25 = sshll.u32 %s412_s24, 4  ;;  %s388_s28 = scalar_lea.hbm %s517_s1, 384  ;;  %s21_s25 = int_to_ptr.vmem [resolvable:$true] %s20_s25 }
   0x2   :  { %p389_p0 = scmp.ne.s32.totalorder %s517_s1, %s388_s28  ;;  %p392_p1 = scmp.lt.u32.totalorder %s388_s28, %s517_s1 }
   0x4   :  { %p394_p2 = pnand %p392_p1, %p389_p0 }
   0x6   :  { %397 = shalt.err (!%p394_p2)
}
   0x7   :  { %s398_s10 = scalar_lea.vmem %s21_s25, 384  ;;  %p403_p4 = scmp.lt.s32.totalorder %s21_s25, %s21_s25 }
   0x8   :  { %p399_p3 = scmp.ne.s32.totalorder %s21_s25, %s398_s10  ;;  %p404_p5 = scmp.lt.s32.totalorder %s398_s10, %s398_s10 }
   0xa   :  { %p405_p6 = por %p404_p5, %p403_p4 }
   0xc   :  { %p406_p7 = pnand %p405_p6, %p399_p3 }
   0xe   :  { %409 = shalt.err (!%p406_p7)
}
   0xf   :  { %s413_s11 = smov 64   ;;  %s414_s12 = smov 4  }
  0x10   :  { %26 = dma.hbm_to_vmem [thread:$0]  %s517_s1, 384, %s21_s25, [#allocation3], %s413_s11, %s413_s11, %s414_s12  }
  0x11   :  { %410 = dma.done.wait [#allocation3], 384  }
  0x12   :  { %411 = vsyncadd [#allocation3], 4294966912  ;;  %v415_v0 = vmov 0.0   ;;  %vm416_vm0 = vmmov 0   ;;  %v376_v1 = vld [vmem:[#allocation2] sm:$0xff]   ;;  %v377_v2 = vld [vmem:[#allocation2 + $0x8] sm:$0xff]  }
  0x13   :  { %337 = vmatprep.subr.bf16.mxu0 %v415_v0  ;;  %343 = vmatprep.mubr.msk.bf16.mxu0 %vm416_vm0, %v415_v0  ;;  %v380_v3 = vld [vmem:[%s519_s3] sm:$0xff]   ;;  %v378_v4 = vld [vmem:[#allocation2 + $0x10] sm:$0xff]   ;;  %v381_v5 = vld [vmem:[%s519_s3 + $0x8] sm:$0xff]   ;;  %vm79_vm1 = vcmask 392192   ;;  %vm166_vm2 = vcmask 523264   ;;  %vm297_vm3 = vcmask 64512  }
  0x14   :  { %347 = vmatprep.subr.bf16.mxu1 %v415_v0  ;;  %355 = vmatprep.mubr.msk.bf16.mxu1 %vm416_vm0, %v415_v0  ;;  %v379_v6 = vld [vmem:[%s516_s0] sm:$0xff]   ;;  %v382_v7 = vld [vmem:[%s519_s3 + $0x10] sm:$0xff]   ;;  %v383_v8 = vld [vmem:[%s519_s3 + $0x18] sm:$0xff]  }
  0x15   :  { %338 = vmatpush3.bf16.msra.mxu0 %v376_v1  ;;  %348 = vmatpush3.bf16.msra.mxu1 %v380_v3  ;;  %v384_v9 = vld [vmem:[%s521_s5] sm:$0xff]   ;;  %v385_v10 = vld [vmem:[%s521_s5 + $0x8] sm:$0xff]   ;;  %v386_v21 = vld [vmem:[%s521_s5 + $0x10] sm:$0xff]  }
  0x16   :  { %339 = vmatprep.subr.bf16.mxu0 %v415_v0  ;;  %349 = vmatprep.subr.bf16.mxu1 %v415_v0  ;;  %v305_v11 = vld [vmem:[%s518_s2] ss:$0 sm:$0xff]  ;;  %v387_v22 = vld [vmem:[%s521_s5 + $0x18] sm:$0xff]  }
  0x17   :  { %v311_v23 = vld [vmem:[%s520_s4] ss:$0 sm:$0xff] }
  0x18   :  { %v317_v33 = vld [vmem:[%s522_s6] ss:$0 sm:$0xff] }
  0x19   :  { %340 = vmatpush3.bf16.msra.mxu0 %v377_v2  ;;  %350 = vmatpush3.bf16.msra.mxu1 %v381_v5 }
  0x1a   :  { %341 = vmatprep.subr.bf16.mxu0 %v415_v0  ;;  %351 = vmatprep.subr.bf16.mxu1 %v415_v0 }
  0x1d   :  { %342 = vmatpush3.bf16.msra.mxu0 %v378_v4  ;;  %352 = vmatpush3.bf16.msra.mxu1 %v382_v7 }
  0x1e   :  { %359 = vmatprep.subr.bf16.mxu0 %v415_v0  ;;  %353 = vmatprep.subr.bf16.mxu1 %v415_v0 }
  0x20   :  { %344 = vmatmul.mubr.msk.bf16.vlgmr.msra.gmra.mrb[0].mxu0 %vm79_vm1, %v379_v6 }
  0x21   :  { %367 = vmatprep.mubr.msk.bf16.mxu0 %vm416_vm0, %v415_v0  ;;  %354 = vmatpush3.bf16.msra.mxu1 %v383_v8 }
  0x22   :  { %360 = vmatpush3.bf16.msra.mxu0 %v384_v9 }
  0x23   :  { %361 = vmatprep.subr.bf16.mxu0 %v415_v0 }
  0x26   :  { %362 = vmatpush3.bf16.msra.mxu0 %v385_v10 }
  0x27   :  { %363 = vmatprep.subr.bf16.mxu0 %v415_v0 }
  0x2a   :  { %364 = vmatpush3.bf16.msra.mxu0 %v386_v21 }
  0x2b   :  { %365 = vmatprep.subr.bf16.mxu0 %v415_v0 }
  0x2e   :  { %366 = vmatpush3.bf16.msra.mxu0 %v387_v22 }
  0xf3   :  { %v117_v12 = vpop.f32.mrb[0].mxu0 }
  0xf4   :  { %v118_v13 = vadd.f32 %v305_v11, %v117_v12  ;;  %v345_v14 = vpop.f32.mrb[1].mxu0 }
  0xf5   :  { %v120_v15 = vpop.f32.mrb[2].mxu0 }
  0xf6   :  { %v121_v16 = vadd.f32 %v305_v11, %v120_v15  ;;  %v346_v17 = vpop.f32.mrb[3].mxu0  ;;  %v124_v18 = vmax.f32 %v118_v13, 0.0 }
  0xf8   :  { %v125_v19 = vmax.f32 %v121_v16, 0.0 }
  0xfa   :  { %v126_v20 = vpack.c.bf16 %v125_v19, %v124_v18 }
  0xfc   :  { %356 = vmatmul.mubr.msk.bf16.vlgmr.msra.gmra.mrb[0].mxu1 %vm166_vm2, %v126_v20 }
 0x1cf   :  { %v204_v24 = vpop.f32.mrb[0].mxu1 }
 0x1d0   :  { %v205_v25 = vadd.f32 %v311_v23, %v204_v24  ;;  %v357_v26 = vpop.f32.mrb[1].mxu1 }
 0x1d1   :  { %v207_v27 = vpop.f32.mrb[2].mxu1 }
 0x1d2   :  { %v208_v28 = vadd.f32 %v311_v23, %v207_v27  ;;  %v358_v29 = vpop.f32.mrb[3].mxu1  ;;  %v211_v30 = vmax.f32 %v205_v25, 0.0 }
 0x1d4   :  { %v212_v31 = vmax.f32 %v208_v28, 0.0 }
 0x1d6   :  { %v213_v32 = vpack.c.bf16 %v212_v31, %v211_v30 }
 0x1d8   :  { %368 = vmatmul.mubr.msk.bf16.vlgmr.msra.gmra.mrb[4].mxu0 %vm166_vm2, %v213_v32 }
 0x2ab   :  { %v290_v34 = vpop.f32.mrb[4].mxu0 }
 0x2ac   :  { %v291_v35 = vadd.f32 %v317_v33, %v290_v34  ;;  %v369_v36 = vpop.f32.mrb[5].mxu0 }
 0x2ad   :  { %v293_v37 = vpop.f32.mrb[6].mxu0 }
 0x2ae   :  { %298 = vst.msk [vmem:[%s523_s7] sm:$0xff] %vm297_vm3, %v291_v35  ;;  %v294_v38 = vadd.f32 %v317_v33, %v293_v37  ;;  %v370_v39 = vpop.f32.mrb[7].mxu0 }
 0x2b0   :  { %299 = vst.msk [vmem:[%s523_s7 + $0x8] sm:$0xff] %vm297_vm3, %v294_v38 }
 0x2b1   :  { %304 = vsyncpa [#allocation3], 1 }

</bundles_post_ra>
